<compile_context>
chip_gen: v7x
topology: tpu7x:2x2x1
jax: 0.10.0
libtpu: 0.0.40
codegen_flags: <defaults>
</compile_context>

<pallas_src>
import jax
import jax.numpy as jnp
from jax.experimental import pallas as pl
from jax.experimental.pallas import tpu as pltpu

HIDDEN = 400      # fc1 / fc3 width
LATENT = 20       # mu / logvar width
OUT_LANES = 128   # lane-dense packed output width
RECON_LANE = 2 * LATENT   # lane 40 holds recon


def _round_up(n, m):
    return ((n + m - 1) // m) * m


def vae_forward_kernel(
    x_ref, eps_ref,
    w1_ref, b1_ref,          # (1, 400), (1, 400)
    wenc_ref, benc_ref,      # fused fc21|fc22, zero-padded: (400, 128), (1, 128)
    w3_ref, b3_ref,          # (20, 400), (1, 400)
    w4_ref,                  # (1, 400)  -- fc4 weight as a row vector
    b4_ref,                  # (1,) scalar in SMEM
    out_ref,                 # (TB, 128): mu[0:20] | logvar[20:40] | recon[40] | 0s
):
    x = x_ref[...]           # (TB, 1)
    eps = eps_ref[...]       # (TB, 20)

    # fc1: contraction dim is 1 -> broadcasted multiply on the VPU, not a
    # degenerate K=1 matmul.
    h1 = jnp.maximum(x * w1_ref[...] + b1_ref[...], 0.0)            # (TB, 400)

    # Fused fc21|fc22 (padded to 128 lanes): one MXU matmul instead of two
    # 20-wide ones.  Padded weight/bias columns are zero, so enc[:, 40:] == 0.
    enc = (jnp.dot(h1, wenc_ref[...], preferred_element_type=jnp.float32)
           + benc_ref[...])                                          # (TB, 128)
    mu = enc[:, 0:LATENT]                                            # (TB, 20)
    logvar = enc[:, LATENT:2 * LATENT]                               # (TB, 20)

    # reparameterize: z = mu + eps * exp(0.5 * logvar)   (EUP exp)
    z = mu + eps * jnp.exp(0.5 * logvar)                             # (TB, 20)

    # fc3: (TB,20) @ (20,400) + bias -> ReLU
    h3 = jnp.maximum(
        jnp.dot(z, w3_ref[...], preferred_element_type=jnp.float32) + b3_ref[...],
        0.0,
    )                                                                # (TB, 400)

    # fc4: N=1 matmul replaced by VPU multiply + XLU lane reduction.
    recon = jnp.sum(h3 * w4_ref[...], axis=-1, keepdims=True) + b4_ref[0]  # (TB, 1)

    # Pack recon into lane RECON_LANE of the already lane-dense encoder tile
    # and write everything with a single unmasked (TB, 128) store.
    lane = jax.lax.broadcasted_iota(jnp.int32, enc.shape, 1)
    out_ref[...] = jnp.where(lane == RECON_LANE, recon, enc)


def pack_params(p):
    """Repack raw (in,out) params into the fused / padded kernel layout."""
    wenc = jnp.zeros((HIDDEN, OUT_LANES), jnp.float32)
    wenc = wenc.at[:, 0:LATENT].set(p["w21"])
    wenc = wenc.at[:, LATENT:2 * LATENT].set(p["w22"])
    benc = jnp.zeros((1, OUT_LANES), jnp.float32)
    benc = benc.at[:, 0:LATENT].set(p["b21"])
    benc = benc.at[:, LATENT:2 * LATENT].set(p["b22"])
    return {
        "w1": p["w1"], "b1": p["b1"],
        "wenc": wenc, "benc": benc,
        "w3": p["w3"], "b3": p["b3"],
        "w4row": p["w4"].reshape(1, HIDDEN),        # (400,1) -> (1,400)
        "b4": p["b4"].reshape(1,),                  # scalar, goes to SMEM
    }


def vae_regressor_forward(x, eps, packed, *, tb=256):
    """x: (B, 1) f32, eps: (B, 20) f32, packed: output of pack_params."""
    B = x.shape[0]
    TB = min(tb, _round_up(B, 8))            # batch tile: mult of 8 sublanes
    Bp = _round_up(B, TB)
    if Bp != B:
        x = jnp.pad(x, ((0, Bp - B), (0, 0)))
        eps = jnp.pad(eps, ((0, Bp - B), (0, 0)))
    grid = (Bp // TB,)

    def batch_spec(cols):
        return pl.BlockSpec((TB, cols), lambda i: (i, 0))

    def const_spec(arr):
        return pl.BlockSpec(arr.shape, lambda i: (0, 0))

    in_specs = [
        batch_spec(1),                    # x
        batch_spec(LATENT),               # eps
        const_spec(packed["w1"]),
        const_spec(packed["b1"]),
        const_spec(packed["wenc"]),
        const_spec(packed["benc"]),
        const_spec(packed["w3"]),
        const_spec(packed["b3"]),
        const_spec(packed["w4row"]),
        pl.BlockSpec(memory_space=pltpu.MemorySpace.SMEM),   # b4 scalar
    ]
    out_spec = batch_spec(OUT_LANES)

    weight_args = (packed["w1"], packed["b1"], packed["wenc"], packed["benc"],
                   packed["w3"], packed["b3"], packed["w4row"], packed["b4"])
    weight_bytes = sum(int(w.size) for w in weight_args) * 4
    io_bytes = 4 * Bp * (1 + LATENT + OUT_LANES)
    cost = pl.CostEstimate(
        flops=2 * Bp * (HIDDEN * OUT_LANES + LATENT * HIDDEN + 2 * HIDDEN),
        transcendentals=Bp * LATENT,
        bytes_accessed=weight_bytes + io_bytes,
    )

    packed_out = pl.pallas_call(
        vae_forward_kernel,
        out_shape=jax.ShapeDtypeStruct((Bp, OUT_LANES), jnp.float32),
        grid=grid,
        in_specs=in_specs,
        out_specs=out_spec,
        compiler_params=pltpu.CompilerParams(
            dimension_semantics=("parallel",)),
        cost_estimate=cost,
    )(x, eps, *weight_args)

    mu = packed_out[:B, 0:LATENT]
    logvar = packed_out[:B, LATENT:2 * LATENT]
    recon = packed_out[:B, RECON_LANE:RECON_LANE + 1]
    return recon, mu, logvar


def init_params(key):
    """Deterministic synthetic init. Weights (in, out); biases (1, out)."""
    ks = jax.random.split(key, 10)

    def lin(kw, kb, fan_in, fan_out):
        bound = 1.0 / jnp.sqrt(fan_in)
        w = jax.random.uniform(kw, (fan_in, fan_out), jnp.float32, -bound, bound)
        b = jax.random.uniform(kb, (1, fan_out), jnp.float32, -bound, bound)
        return w, b

    p = {}
    p["w1"], p["b1"] = lin(ks[0], ks[1], 1, HIDDEN)
    p["w21"], p["b21"] = lin(ks[2], ks[3], HIDDEN, LATENT)
    p["w22"], p["b22"] = lin(ks[4], ks[5], HIDDEN, LATENT)
    p["w3"], p["b3"] = lin(ks[6], ks[7], LATENT, HIDDEN)
    p["w4"], p["b4"] = lin(ks[8], ks[9], HIDDEN, 1)
    return p


def reference_forward(x, eps, p):
    """Pure-JAX reference mirroring the PyTorch forward."""
    h1 = jnp.maximum(x @ p["w1"] + p["b1"], 0.0)
    mu = h1 @ p["w21"] + p["b21"]
    logvar = h1 @ p["w22"] + p["b22"]
    z = mu + eps * jnp.exp(0.5 * logvar)
    h3 = jnp.maximum(z @ p["w3"] + p["b3"], 0.0)
    recon = h3 @ p["w4"] + p["b4"]
    return recon, mu, logvar


if __name__ == "__main__":
    key = jax.random.PRNGKey(0)
    kp, kx, ke = jax.random.split(key, 3)

    params = init_params(kp)
    packed = pack_params(params)

    B = 8
    x = jax.random.normal(kx, (B, 1), jnp.float32)
    eps = jax.random.normal(ke, (B, LATENT), jnp.float32)  # reparameterization noise
    # TODO(synk): torch.randn_like noise is drawn host-side here (as eps) so the
    # kernel stays deterministic and checkable against the reference.

    recon, mu, logvar = vae_regressor_forward(x, eps, packed)
    jax.block_until_ready((recon, mu, logvar))

    r_ref, m_ref, lv_ref = reference_forward(x, eps, params)
    assert jnp.allclose(recon, r_ref, atol=1e-4, rtol=1e-4)
    assert jnp.allclose(mu, m_ref, atol=1e-5, rtol=1e-5)
    assert jnp.allclose(logvar, lv_ref, atol=1e-5, rtol=1e-5)

    print("KERNEL_OK")
</pallas_src>

<mosaic_0001>
module attributes {stable_mosaic.version = 11 : i64} {
  func.func @vae_forward_kernel(%arg0: i32, %arg1: memref<8x1xf32, #tpu.memory_space<vmem>>, %arg2: memref<8x20xf32, #tpu.memory_space<vmem>>, %arg3: memref<1x400xf32, #tpu.memory_space<vmem>>, %arg4: memref<1x400xf32, #tpu.memory_space<vmem>>, %arg5: memref<400x128xf32, #tpu.memory_space<vmem>>, %arg6: memref<1x128xf32, #tpu.memory_space<vmem>>, %arg7: memref<20x400xf32, #tpu.memory_space<vmem>>, %arg8: memref<1x400xf32, #tpu.memory_space<vmem>>, %arg9: memref<1x400xf32, #tpu.memory_space<vmem>>, %arg10: memref<1xf32, #tpu.memory_space<smem>>, %arg11: memref<8x128xf32, #tpu.memory_space<vmem>>) attributes {dimension_semantics = [#tpu.dimension_semantics<parallel>], iteration_bounds = array<i64: 1>, scalar_prefetch = 0 : i64, scratch_operands = 0 : i64, tpu.core_type = #tpu.core_type<tc>, window_params = [{transform_indices = @transform_0, window_bounds = array<i64: 8, 1>}, {transform_indices = @transform_1, window_bounds = array<i64: 8, 20>}, {pipeline_mode = #tpu.pipeline_mode<synchronous>, transform_indices = @transform_2, window_bounds = array<i64: 1, 400>}, {pipeline_mode = #tpu.pipeline_mode<synchronous>, transform_indices = @transform_3, window_bounds = array<i64: 1, 400>}, {pipeline_mode = #tpu.pipeline_mode<synchronous>, transform_indices = @transform_4, window_bounds = array<i64: 400, 128>}, {pipeline_mode = #tpu.pipeline_mode<synchronous>, transform_indices = @transform_5, window_bounds = array<i64: 1, 128>}, {pipeline_mode = #tpu.pipeline_mode<synchronous>, transform_indices = @transform_6, window_bounds = array<i64: 20, 400>}, {pipeline_mode = #tpu.pipeline_mode<synchronous>, transform_indices = @transform_7, window_bounds = array<i64: 1, 400>}, {pipeline_mode = #tpu.pipeline_mode<synchronous>, transform_indices = @transform_8, window_bounds = array<i64: 1, 400>}, {transform_indices = @transform_9, window_bounds = array<i64: 1>}, {transform_indices = @transform_10, window_bounds = array<i64: 8, 128>}]} {
    %c0 = arith.constant 0 : index
    %c0_0 = arith.constant 0 : index
    %0 = vector.load %arg1[%c0, %c0_0] : memref<8x1xf32, #tpu.memory_space<vmem>>, vector<8x1xf32>
    %c0_1 = arith.constant 0 : index
    %c0_2 = arith.constant 0 : index
    %1 = vector.load %arg2[%c0_1, %c0_2] : memref<8x20xf32, #tpu.memory_space<vmem>>, vector<8x20xf32>
    %c0_3 = arith.constant 0 : index
    %c0_4 = arith.constant 0 : index
    %2 = vector.load %arg3[%c0_3, %c0_4] : memref<1x400xf32, #tpu.memory_space<vmem>>, vector<1x400xf32>
    %3 = vector.broadcast %0 : vector<8x1xf32> to vector<8x400xf32>
    %4 = vector.broadcast %2 : vector<1x400xf32> to vector<8x400xf32>
    %5 = arith.mulf %3, %4 : vector<8x400xf32>
    %c0_5 = arith.constant 0 : index
    %c0_6 = arith.constant 0 : index
    %6 = vector.load %arg4[%c0_5, %c0_6] : memref<1x400xf32, #tpu.memory_space<vmem>>, vector<1x400xf32>
    %7 = vector.broadcast %6 : vector<1x400xf32> to vector<8x400xf32>
    %8 = arith.addf %5, %7 : vector<8x400xf32>
    %cst = arith.constant 0.000000e+00 : f32
    %9 = vector.broadcast %cst : f32 to vector<8x400xf32>
    %10 = arith.maximumf %8, %9 : vector<8x400xf32>
    %c0_7 = arith.constant 0 : index
    %c0_8 = arith.constant 0 : index
    %11 = vector.load %arg5[%c0_7, %c0_8] : memref<400x128xf32, #tpu.memory_space<vmem>>, vector<400x128xf32>
    %cst_9 = arith.constant dense<0.000000e+00> : vector<8x128xf32>
    %12 = tpu.matmul %10, %11, %cst_9 {dimension_numbers = #tpu.dot_dimension_numbers<[1], [0], [0], [1], [0, 0, 1, 1], [], []>} : vector<8x400xf32>, vector<400x128xf32>, vector<8x128xf32> -> vector<8x128xf32>
    %c0_10 = arith.constant 0 : index
    %c0_11 = arith.constant 0 : index
    %13 = vector.load %arg6[%c0_10, %c0_11] : memref<1x128xf32, #tpu.memory_space<vmem>>, vector<1x128xf32>
    %14 = vector.broadcast %13 : vector<1x128xf32> to vector<8x128xf32>
    %15 = arith.addf %12, %14 : vector<8x128xf32>
    %16 = vector.extract_strided_slice %15 {offsets = [0, 0], sizes = [8, 20], strides = [1, 1]} : vector<8x128xf32> to vector<8x20xf32>
    %17 = vector.extract_strided_slice %15 {offsets = [0, 20], sizes = [8, 20], strides = [1, 1]} : vector<8x128xf32> to vector<8x20xf32>
    %cst_12 = arith.constant 5.000000e-01 : f32
    %18 = vector.broadcast %cst_12 : f32 to vector<8x20xf32>
    %19 = arith.mulf %18, %17 : vector<8x20xf32>
    %20 = math.exp %19 : vector<8x20xf32>
    %21 = arith.mulf %1, %20 : vector<8x20xf32>
    %22 = arith.addf %16, %21 : vector<8x20xf32>
    %c0_13 = arith.constant 0 : index
    %c0_14 = arith.constant 0 : index
    %23 = vector.load %arg7[%c0_13, %c0_14] : memref<20x400xf32, #tpu.memory_space<vmem>>, vector<20x400xf32>
    %cst_15 = arith.constant dense<0.000000e+00> : vector<8x400xf32>
    %24 = tpu.matmul %22, %23, %cst_15 {dimension_numbers = #tpu.dot_dimension_numbers<[1], [0], [0], [1], [0, 0, 1, 1], [], []>} : vector<8x20xf32>, vector<20x400xf32>, vector<8x400xf32> -> vector<8x400xf32>
    %c0_16 = arith.constant 0 : index
    %c0_17 = arith.constant 0 : index
    %25 = vector.load %arg8[%c0_16, %c0_17] : memref<1x400xf32, #tpu.memory_space<vmem>>, vector<1x400xf32>
    %26 = vector.broadcast %25 : vector<1x400xf32> to vector<8x400xf32>
    %27 = arith.addf %24, %26 : vector<8x400xf32>
    %cst_18 = arith.constant 0.000000e+00 : f32
    %28 = vector.broadcast %cst_18 : f32 to vector<8x400xf32>
    %29 = arith.maximumf %27, %28 : vector<8x400xf32>
    %c0_19 = arith.constant 0 : index
    %c0_20 = arith.constant 0 : index
    %30 = vector.load %arg9[%c0_19, %c0_20] : memref<1x400xf32, #tpu.memory_space<vmem>>, vector<1x400xf32>
    %31 = vector.broadcast %30 : vector<1x400xf32> to vector<8x400xf32>
    %32 = arith.mulf %29, %31 : vector<8x400xf32>
    %cst_21 = arith.constant dense<0.000000e+00> : vector<8xf32>
    %33 = vector.multi_reduction <add>, %32, %cst_21 [1] : vector<8x400xf32> to vector<8xf32>
    %34 = vector.shape_cast %33 : vector<8xf32> to vector<8x1xf32>
    %c0_22 = arith.constant 0 : index
    %35 = memref.load %arg10[%c0_22] : memref<1xf32, #tpu.memory_space<smem>>
    %36 = vector.broadcast %35 : f32 to vector<8x1xf32>
    %37 = arith.addf %34, %36 : vector<8x1xf32>
    %38 = tpu.iota {dimensions = array<i32: 1>} : vector<8x128xi32>
    %c40_i32 = arith.constant 40 : i32
    %39 = vector.broadcast %c40_i32 : i32 to vector<8x128xi32>
    %40 = arith.cmpi eq, %38, %39 : vector<8x128xi32>
    %41 = vector.shape_cast %37 : vector<8x1xf32> to vector<8x1xf32>
    %42 = vector.broadcast %41 : vector<8x1xf32> to vector<8x128xf32>
    %43 = arith.select %40, %42, %15 : vector<8x128xi1>, vector<8x128xf32>
    %c0_23 = arith.constant 0 : index
    %c0_24 = arith.constant 0 : index
    %44 = vector.load %arg11[%c0_23, %c0_24] : memref<8x128xf32, #tpu.memory_space<vmem>>, vector<8x128xf32>
    tpu.vector_store %arg11[%c0_23, %c0_24], %43 {strides = array<i32>} : memref<8x128xf32, #tpu.memory_space<vmem>>, vector<8x128xf32>,
    return
  }
  func.func @transform_0(%arg0: i32) -> (i32, i32) {
    %c0_i32 = arith.constant 0 : i32
    %c0_i32_0 = arith.constant 0 : i32
    return %arg0, %c0_i32 : i32, i32
  }
  func.func @transform_1(%arg0: i32) -> (i32, i32) {
    %c0_i32 = arith.constant 0 : i32
    %c0_i32_0 = arith.constant 0 : i32
    return %arg0, %c0_i32 : i32, i32
  }
  func.func @transform_2(%arg0: i32) -> (i32, i32) {
    %c0_i32 = arith.constant 0 : i32
    %c0_i32_0 = arith.constant 0 : i32
    %c0_i32_1 = arith.constant 0 : i32
    return %c0_i32, %c0_i32_0 : i32, i32
  }
  func.func @transform_3(%arg0: i32) -> (i32, i32) {
    %c0_i32 = arith.constant 0 : i32
    %c0_i32_0 = arith.constant 0 : i32
    %c0_i32_1 = arith.constant 0 : i32
    return %c0_i32, %c0_i32_0 : i32, i32
  }
  func.func @transform_4(%arg0: i32) -> (i32, i32) {
    %c0_i32 = arith.constant 0 : i32
    %c0_i32_0 = arith.constant 0 : i32
    %c0_i32_1 = arith.constant 0 : i32
    return %c0_i32, %c0_i32_0 : i32, i32
  }
  func.func @transform_5(%arg0: i32) -> (i32, i32) {
    %c0_i32 = arith.constant 0 : i32
    %c0_i32_0 = arith.constant 0 : i32
    %c0_i32_1 = arith.constant 0 : i32
    return %c0_i32, %c0_i32_0 : i32, i32
  }
  func.func @transform_6(%arg0: i32) -> (i32, i32) {
    %c0_i32 = arith.constant 0 : i32
    %c0_i32_0 = arith.constant 0 : i32
    %c0_i32_1 = arith.constant 0 : i32
    return %c0_i32, %c0_i32_0 : i32, i32
  }
  func.func @transform_7(%arg0: i32) -> (i32, i32) {
    %c0_i32 = arith.constant 0 : i32
    %c0_i32_0 = arith.constant 0 : i32
    %c0_i32_1 = arith.constant 0 : i32
    return %c0_i32, %c0_i32_0 : i32, i32
  }
  func.func @transform_8(%arg0: i32) -> (i32, i32) {
    %c0_i32 = arith.constant 0 : i32
    %c0_i32_0 = arith.constant 0 : i32
    %c0_i32_1 = arith.constant 0 : i32
    return %c0_i32, %c0_i32_0 : i32, i32
  }
  func.func @transform_9(%arg0: i32) -> i32 {
    %c0_i32 = arith.constant 0 : i32
    %c0_i32_0 = arith.constant 0 : i32
    return %c0_i32 : i32
  }
  func.func @transform_10(%arg0: i32) -> (i32, i32) {
    %c0_i32 = arith.constant 0 : i32
    %c0_i32_0 = arith.constant 0 : i32
    return %arg0, %c0_i32 : i32, i32
  }
}

</mosaic_0001>

<bundles_post_ra>
// kernel: tpu_custom_call.1
= control target key start
LH: loop header
LB: loop body
LE: loop exit
PB: predicated region body
PF: predicated region fallthrough
CT: control target
= control target key end

     0   :  { %16 = vsyncpa [#allocation4], 0  ;;  %s955_s0 = inlined_call_operand.vmem [shape: f32[8,1], index: 0, kind: input, shape index: {}]   ;;  %s956_s1 = inlined_call_operand.vmem [shape: f32[8,20], index: 1, kind: input, shape index: {}]   ;;  %s957_s2 = inlined_call_operand.vmem [shape: f32[1,400], index: 2, kind: input, shape index: {}]   ;;  %s958_s3 = inlined_call_operand.vmem [shape: f32[1,400], index: 3, kind: input, shape index: {}]   ;;  %s959_s4 = inlined_call_operand.hbm [shape: f32[400,128], index: 4, kind: input, shape index: {}]   ;;  %s960_s5 = inlined_call_operand.vmem [shape: f32[1,128], index: 5, kind: input, shape index: {}]   ;;  %s961_s6 = inlined_call_operand.hbm [shape: f32[20,400], index: 6, kind: input, shape index: {}]   ;;  %s962_s7 = inlined_call_operand.vmem [shape: f32[1,400], index: 7, kind: input, shape index: {}]   ;;  %s963_s8 = inlined_call_operand.vmem [shape: f32[1,400], index: 8, kind: input, shape index: {}]   ;;  %s964_s9 = inlined_call_operand.<no memory space> [shape: f32[1], index: 9, kind: input, shape index: {}]   ;;  %s965_s10 = inlined_call_operand.hbm [shape: f32[8,128], index: 10, kind: output, shape index: {}]  }
   0x1   :  { %17 = vsyncpa [#allocation7], 0 }
   0x2   :  { %18 = vsyncpa [#allocation5], 0  ;;  %s787_s13 = smov [#allocation3]   ;;  %s715_s17 = scalar_lea.hbm %s959_s4, 6400 }
   0x3   :  { %s32_s14 = sshll.u32 %s787_s13, 4  ;;  %p716_p0 = scmp.ne.s32.totalorder %s959_s4, %s715_s17  ;;  %s33_s14 = int_to_ptr.vmem [resolvable:$true] %s32_s14 }
   0x4   :  { %p719_p1 = scmp.lt.u32.totalorder %s715_s17, %s959_s4 }
   0x6   :  { %p721_p2 = pnand %p719_p1, %p716_p0 }
   0x8   :  { %724 = shalt.err (!%p721_p2)
}
   0x9   :  { %s725_s22 = scalar_lea.vmem %s33_s14, 6400  ;;  %p730_p4 = scmp.lt.s32.totalorder %s33_s14, %s33_s14 }
   0xa   :  { %p726_p3 = scmp.ne.s32.totalorder %s33_s14, %s725_s22  ;;  %p731_p5 = scmp.lt.s32.totalorder %s725_s22, %s725_s22 }
   0xc   :  { %p732_p6 = por %p731_p5, %p730_p4 }
   0xe   :  { %p733_p7 = pnand %p732_p6, %p726_p3 }
  0x10   :  { %736 = shalt.err (!%p733_p7)
}
  0x11   :  { %s788_s23 = smov 128   ;;  %s789_s24 = smov 8  }
  0x12   :  { %38 = dma.hbm_to_vmem [thread:$0]  %s959_s4, 6400, %s33_s14, [#allocation4], %s788_s23, %s788_s23, %s789_s24  }
  0x13   :  { %s790_s27 = smov [#allocation6]   ;;  %s737_s11 = scalar_lea.hbm %s961_s6, 1536 }
  0x14   :  { %s46_s28 = sshll.u32 %s790_s27, 4  ;;  %p738_p8 = scmp.ne.s32.totalorder %s961_s6, %s737_s11  ;;  %s47_s28 = int_to_ptr.vmem [resolvable:$true] %s46_s28 }
  0x15   :  { %p741_p9 = scmp.lt.u32.totalorder %s737_s11, %s961_s6 }
  0x17   :  { %p743_p10 = pnand %p741_p9, %p738_p8 }
  0x19   :  { %746 = shalt.err (!%p743_p10)
}
  0x1a   :  { %s747_s17 = scalar_lea.vmem %s47_s28, 1536  ;;  %p752_p12 = scmp.lt.s32.totalorder %s47_s28, %s47_s28 }
  0x1b   :  { %p748_p11 = scmp.ne.s32.totalorder %s47_s28, %s747_s17  ;;  %p753_p13 = scmp.lt.s32.totalorder %s747_s17, %s747_s17 }
  0x1d   :  { %p754_p0 = por %p753_p13, %p752_p12 }
  0x1f   :  { %p755_p1 = pnand %p754_p0, %p748_p11 }
  0x21   :  { %758 = shalt.err (!%p755_p1)
}
  0x22   :  { %s791_s4 = smov 512   ;;  %s792_s14 = smov 32  }
  0x23   :  { %52 = dma.hbm_to_vmem [thread:$0]  %s961_s6, 1536, %s47_s28, [#allocation7], %s791_s4, %s791_s4, %s792_s14  }
  0x24   :  { %781 = dma.done.wait [#allocation4], 6400  }
  0x25   :  { %782 = vsyncadd [#allocation4], 4294960896 }
  0x26   :  { %783 = dma.done.wait [#allocation7], 1536  }
  0x27   :  { %784 = vsyncadd [#allocation7], 4294965760  ;;  %v793_v0 = vmov 0   ;;  %v794_v1 = vmov 0.0|0.0   ;;  %v65_v2 = vld [vmem:[%s955_s0] sm:$0xff]  ;;  %v161_v4 = vld [vmem:[#allocation3 + $0x108] sm:$0xff] }
  0x28   :  { %712 = vset.pattern.permute.xlu0 %v793_v0  ;;  %666 = vmatprep.subr.bf16.mxu1 %v794_v1  ;;  %v160_v3 = vld [vmem:[#allocation3 + $0x100] sm:$0xff]  ;;  %v145_v7 = vld [vmem:[#allocation3 + $0x88] sm:$0xff]  ;;  %v162_v11 = vld [vmem:[#allocation3 + $0x110] sm:$0xff]  ;;  %vm185_vm0 = vcmask 130048   ;;  %vm376_vm1 = vcmask 1043456   ;;  %vm372_vm2 = vcmask 162816  }
  0x29   :  { %70 = vperm.xlu0 %712, %v65_v2   ;;  %v667_v5 = vpack.c.bf16 %v161_v4, %v160_v3  ;;  %v144_v6 = vld [vmem:[#allocation3 + $0x80] sm:$0xff]  ;;  %v129_v10 = vld [vmem:[#allocation3 + $0x8] sm:$0xff]  ;;  %v163_v12 = vld [vmem:[#allocation3 + $0x118] sm:$0xff] }
  0x2a   :  { %v128_v8 = vld [vmem:[#allocation3] sm:$0xff]  ;;  %v634_v9 = vpack.c.bf16 %v145_v7, %v144_v6  ;;  %v670_v14 = vpack.c.bf16 %v163_v12, %v162_v11  ;;  %v146_v15 = vld [vmem:[#allocation3 + $0x90] sm:$0xff]  ;;  %v147_v16 = vld [vmem:[#allocation3 + $0x98] sm:$0xff] }
  0x2b   :  { %668 = vmatpush1.bf16.msra.mxu1 %v667_v5  ;;  %v636_v13 = vpack.c.bf16 %v129_v10, %v128_v8  ;;  %v130_v17 = vld [vmem:[#allocation3 + $0x10] sm:$0xff]  ;;  %v638_v18 = vpack.c.bf16 %v147_v16, %v146_v15  ;;  %v131_v19 = vld [vmem:[#allocation3 + $0x18] sm:$0xff]  ;;  %v164_v20 = vld [vmem:[#allocation3 + $0x120] sm:$0xff]  ;;  %v74_v15 = vlaneseq }
  0x2c   :  { %635 = vmatprep.subr.bf16.mxu0 %v634_v9  ;;  %669 = vmatprep.subr.bf16.mxu1 %v794_v1  ;;  %v165_v21 = vld [vmem:[#allocation3 + $0x128] sm:$0xff]  ;;  %v640_v22 = vpack.c.bf16 %v131_v19, %v130_v17  ;;  %v148_v23 = vld [vmem:[#allocation3 + $0xa0] sm:$0xff]  ;;  %v150_v29 = vld [vmem:[#allocation3 + $0xb0] sm:$0xff] }
  0x2d   :  { %637 = vmatpush3.bf16.msra.mxu0 %v636_v13  ;;  %v149_v24 = vld [vmem:[#allocation3 + $0xa8] sm:$0xff]  ;;  %v132_v26 = vld [vmem:[#allocation3 + $0x20] sm:$0xff]  ;;  %v673_v28 = vpack.c.bf16 %v165_v21, %v164_v20  ;;  %v151_v30 = vld [vmem:[#allocation3 + $0xb8] sm:$0xff]  ;;  %v75_v16 = vshrl.u32 %v74_v15, 7 }
  0x2e   :  { %639 = vmatprep.subr.bf16.mxu0 %v638_v18  ;;  %v642_v25 = vpack.c.bf16 %v149_v24, %v148_v23  ;;  %v133_v27 = vld [vmem:[#allocation3 + $0x28] sm:$0xff]  ;;  %v166_v31 = vld [vmem:[#allocation3 + $0x130] sm:$0xff]  ;;  %v167_v32 = vld [vmem:[#allocation3 + $0x138] sm:$0xff]  ;;  %v646_v34 = vpack.c.bf16 %v151_v30, %v150_v29 }
  0x2f   :  { %671 = vmatpush1.bf16.msra.mxu1 %v670_v14  ;;  %v644_v33 = vpack.c.bf16 %v133_v27, %v132_v26  ;;  %v134_v35 = vld [vmem:[#allocation3 + $0x30] sm:$0xff]  ;;  %v135_v36 = vld [vmem:[#allocation3 + $0x38] sm:$0xff]  ;;  %v676_v37 = vpack.c.bf16 %v167_v32, %v166_v31  ;;  %v152_v38 = vld [vmem:[#allocation3 + $0xc0] sm:$0xff]  ;;  %v890_v17 = vsub.s32 0, %v75_v16  ;;  %v892_v18 = vsub.s32 2, %v75_v16 }
  0x30   :  { %672 = vmatprep.subr.bf16.mxu1 %v794_v1  ;;  %v153_v39 = vld [vmem:[#allocation3 + $0xc8] sm:$0xff]  ;;  %v168_v40 = vld [vmem:[#allocation3 + $0x140] sm:$0xff]  ;;  %v648_v42 = vpack.c.bf16 %v135_v36, %v134_v35  ;;  %v154_v47 = vld [vmem:[#allocation3 + $0xd0] sm:$0xff]  ;;  %v894_v19 = vsub.s32 1, %v75_v16  ;;  %v896_v20 = vsub.s32 3, %v75_v16 }
  0x31   :  { %641 = vmatpush3.bf16.msra.mxu0 %v640_v22  ;;  %v169_v41 = vld [vmem:[#allocation3 + $0x148] sm:$0xff]  ;;  %v650_v43 = vpack.c.bf16 %v153_v39, %v152_v38  ;;  %v136_v44 = vld [vmem:[#allocation3 + $0x40] sm:$0xff]  ;;  %v155_v48 = vld [vmem:[#allocation3 + $0xd8] sm:$0xff] }
  0x32   :  { %643 = vmatprep.subr.bf16.mxu0 %v642_v25  ;;  %v137_v45 = vld [vmem:[#allocation3 + $0x48] sm:$0xff]  ;;  %v679_v46 = vpack.c.bf16 %v169_v41, %v168_v40  ;;  %v170_v49 = vld [vmem:[#allocation3 + $0x150] sm:$0xff]  ;;  %v171_v50 = vld [vmem:[#allocation3 + $0x158] sm:$0xff]  ;;  %v654_v52 = vpack.c.bf16 %v155_v48, %v154_v47 }
  0x33   :  { %674 = vmatpush1.bf16.msra.mxu1 %v673_v28  ;;  %v652_v51 = vpack.c.bf16 %v137_v45, %v136_v44  ;;  %v138_v53 = vld [vmem:[#allocation3 + $0x50] sm:$0xff]  ;;  %v139_v54 = vld [vmem:[#allocation3 + $0x58] sm:$0xff]  ;;  %v682_v55 = vpack.c.bf16 %v171_v50, %v170_v49  ;;  %v156_v56 = vld [vmem:[#allocation3 + $0xe0] sm:$0xff] }
  0x34   :  { %675 = vmatprep.subr.bf16.mxu1 %v794_v1  ;;  %v157_v57 = vld [vmem:[#allocation3 + $0xe8] sm:$0xff]  ;;  %v172_v58 = vld [vmem:[#allocation3 + $0x160] sm:$0xff]  ;;  %v656_v60 = vpack.c.bf16 %v139_v54, %v138_v53  ;;  %v158_v2 = vld [vmem:[#allocation3 + $0xf0] sm:$0xff] }
  0x35   :  { %645 = vmatpush3.bf16.msra.mxu0 %v644_v33  ;;  %v173_v59 = vld [vmem:[#allocation3 + $0x168] sm:$0xff]  ;;  %v658_v61 = vpack.c.bf16 %v157_v57, %v156_v56  ;;  %v140_v62 = vld [vmem:[#allocation3 + $0x60] sm:$0xff]  ;;  %v159_v3 = vld [vmem:[#allocation3 + $0xf8] sm:$0xff] }
  0x36   :  { %647 = vmatprep.subr.bf16.mxu0 %v646_v34  ;;  %v141_v63 = vld [vmem:[#allocation3 + $0x68] sm:$0xff]  ;;  %v685_v0 = vpack.c.bf16 %v173_v59, %v172_v58  ;;  %v174_v4 = vld [vmem:[#allocation3 + $0x170] sm:$0xff]  ;;  %v175_v5 = vld [vmem:[#allocation3 + $0x178] sm:$0xff]  ;;  %v662_v7 = vpack.c.bf16 %v159_v3, %v158_v2 }
  0x37   :  { %677 = vmatpush1.bf16.msra.mxu1 %v676_v37  ;;  %v660_v6 = vpack.c.bf16 %v141_v63, %v140_v62  ;;  %v142_v8 = vld [vmem:[#allocation3 + $0x70] sm:$0xff]  ;;  %v143_v9 = vld [vmem:[#allocation3 + $0x78] sm:$0xff]  ;;  %v688_v10 = vpack.c.bf16 %v175_v5, %v174_v4  ;;  %v176_v11 = vld [vmem:[#allocation3 + $0x180] sm:$0xff] }
  0x38   :  { %678 = vmatprep.subr.bf16.mxu1 %v794_v1  ;;  %v177_v12 = vld [vmem:[#allocation3 + $0x188] sm:$0xff]  ;;  %v664_v13 = vpack.c.bf16 %v143_v9, %v142_v8  ;;  %v67_v21 = vld [vmem:[%s957_s2] sm:$0xf]  ;;  %v343_v44 = vld [vmem:[#allocation6 + $0x28] sm:$0xff] }
  0x39   :  { %649 = vmatpush3.bf16.msra.mxu0 %v648_v42  ;;  %v691_v14 = vpack.c.bf16 %v177_v12, %v176_v11  ;;  %v77_v22 = vrot.slane %v67_v21, %v890_v17  ;;  %v85_v23 = vrot.slane %v67_v21, %v892_v18  ;;  %v81_v24 = vrot.slane %v67_v21, %v894_v19  ;;  %v338_v45 = vld [vmem:[#allocation6] sm:$0xff]  ;;  %v341_v48 = vld [vmem:[#allocation6 + $0x18] sm:$0xff]  ;;  %v344_v53 = vld [vmem:[#allocation6 + $0x30] sm:$0xff] }
  0x3a   :  { %651 = vmatprep.subr.bf16.mxu0 %v650_v43  ;;  %v89_v25 = vrot.slane %v67_v21, %v896_v20  ;;  %v339_v43 = vld [vmem:[#allocation6 + $0x8] sm:$0xff]  ;;  %v342_v47 = vld [vmem:[#allocation6 + $0x20] sm:$0xff]  ;;  %v345_v49 = vld [vmem:[#allocation6 + $0x38] sm:$0xff] }
  0x3b   :  { %680 = vmatpush1.bf16.msra.mxu1 %v679_v46  ;;  %v693_v46 = vpack.c.bf16 %v343_v44, %v339_v43  ;;  %v695_v50 = vpack.c.bf16 %v342_v47, %v338_v45  ;;  %v591_v57 = vld [vmem:[%s960_s5] ss:$0 sm:$0xff]  ;;  %v347_v2 = vld [vmem:[#allocation6 + $0x48] sm:$0xf]  ;;  %v349_v3 = vld [vmem:[#allocation6 + $0x58] sm:$0xf] }
  0x3c   :  { %681 = vmatprep.subr.bf16.mxu1 %v794_v1  ;;  %v346_v4 = vld [vmem:[#allocation6 + $0x40] sm:$0xf]  ;;  %v348_v5 = vld [vmem:[#allocation6 + $0x50] sm:$0xf]  ;;  %s796_s5 = smov 108  }
  0x3d   :  { %653 = vmatpush3.bf16.msra.mxu0 %v652_v51  ;;  %v697_v51 = vpack.c.bf16 %v345_v49, %v341_v48  ;;  %v66_v8 = vld [vmem:[%s956_s1] sm:$0xff] }
  0x3e   :  { %655 = vmatprep.subr.bf16.mxu0 %v654_v52  ;;  %v340_v52 = vld [vmem:[#allocation6 + $0x10] sm:$0xff] }
  0x3f   :  { %683 = vmatpush1.bf16.msra.mxu1 %v682_v55  ;;  %v699_v54 = vpack.c.bf16 %v344_v53, %v340_v52  ;;  %v350_v12 = vld [vmem:[%s962_s7] sm:$0xf] }
  0x40   :  { %684 = vmatprep.subr.bf16.mxu1 %v794_v1  ;;  %v535_v16 = vld [vmem:[%s963_s8] sm:$0xf]  ;;  %v359_v21 = vrot.slane %v350_v12, %v894_v19  ;;  %s797_s8 = smov [#allocation8]  }
  0x41   :  { %657 = vmatpush3.bf16.msra.mxu0 %v656_v60  ;;  %s581_s30 = sshll.u32 %s797_s8, 4  ;;  %s582_s30 = int_to_ptr.vmem [resolvable:$true] %s581_s30 }
  0x42   :  { %659 = vmatprep.subr.bf16.mxu0 %v658_v61  ;;  %s759_s11 = scalar_lea.vmem %s582_s30, 128  ;;  %p764_p3 = scmp.lt.s32.totalorder %s582_s30, %s582_s30 }
  0x43   :  { %686 = vmatpush1.bf16.msra.mxu1 %v685_v0  ;;  %p760_p2 = scmp.ne.s32.totalorder %s582_s30, %s759_s11  ;;  %p765_p4 = scmp.lt.s32.totalorder %s759_s11, %s759_s11 }
  0x44   :  { %687 = vmatprep.subr.bf16.mxu1 %v794_v1 }
  0x45   :  { %661 = vmatpush3.bf16.msra.mxu0 %v660_v6  ;;  %v795_v6 = vmov 0.0   ;;  %p766_p5 = por %p765_p4, %p764_p3 }
  0x46   :  { %663 = vmatprep.subr.bf16.mxu0 %v662_v7 }
  0x47   :  { %689 = vmatpush1.bf16.msra.mxu1 %v688_v10  ;;  %p767_p6 = pnand %p766_p5, %p760_p2 }
  0x48   :  { %690 = vmatprep.subr.bf16.mxu1 %v794_v1  ;;  %v98_v1 = vld [vmem:[%s958_s3] sm:$0xf] }
  0x49   :  { %665 = vmatpush3.bf16.msra.mxu0 %v664_v13  ;;  %v107_v26 = vrot.slane %v98_v1, %v894_v19  ;;  %v115_v27 = vrot.slane %v98_v1, %v896_v20  ;;  %v103_v28 = vrot.slane %v98_v1, %v890_v17  ;;  %v111_v29 = vrot.slane %v98_v1, %v892_v18 }
  0x4a   :  { %694 = vmatprep.subr.bf16.mxu0 %v693_v46  ;;  %v355_v13 = vrot.slane %v350_v12, %v890_v17  ;;  %v367_v1 = vrot.slane %v350_v12, %v896_v20 }
  0x4b   :  { %692 = vmatpush1.bf16.msra.mxu1 %v691_v14  ;;  %v363_v14 = vrot.slane %v350_v12, %v892_v18 }
  0x4c   :  { %698 = vmatprep.subr.bf16.mxu1 %v697_v51 }
  0xa8   :  { %v71_v30 = vpop.permute.xlu0 %70 }
  0xa9   :  { %v94_v31 = vmul.f32 %v77_v22, %v71_v30  ;;  %v96_v32 = vmul.f32 %v85_v23, %v71_v30  ;;  %v95_v33 = vmul.f32 %v81_v24, %v71_v30  ;;  %v97_v34 = vmul.f32 %v89_v25, %v71_v30 }
  0xaa   :  { %v540_v25 = vrot.slane %v535_v16, %v890_v17  ;;  %v544_v30 = vrot.slane %v535_v16, %v894_v19  ;;  %v571_v19 = vand.u32 127, %v74_v15 }
  0xab   :  { %v121_v35 = vadd.f32 %v107_v26, %v95_v33  ;;  %v123_v36 = vadd.f32 %v115_v27, %v97_v34  ;;  %v120_v37 = vadd.f32 %v103_v28, %v94_v31  ;;  %v122_v38 = vadd.f32 %v111_v29, %v96_v32 }
  0xac   :  { %v552_v33 = vrot.slane %v535_v16, %v896_v20  ;;  %v568_v20 = vstv %s964_s9  ;;  %vm572_vm3 = vcmp.eq.s32.totalorder %v571_v19, 40 }
  0xad   :  { %v125_v39 = vmax.f32 %v121_v35, 0.0  ;;  %v127_v40 = vmax.f32 %v123_v36, 0.0  ;;  %v124_v41 = vmax.f32 %v120_v37, 0.0  ;;  %v126_v42 = vmax.f32 %v122_v38, 0.0 }
  0xae   :  { %v548_v35 = vrot.slane %v535_v16, %v892_v18 }
  0xaf   :  { %253 = vmatprep.mubr.f32.mxu0 %v125_v39  ;;  %592 = vmatprep.mubr.msk.f32.mxu1 %vm185_vm0, %v127_v40 }
  0xb0   :  { %254 = vmatmul.mubr.f32.vlgmr.msra.gmra.mrb[0].mxu0 %v124_v41  ;;  %324 = vmatmul.mubr.f32.vlgmr.msra.gmra.mrb[0].mxu1 %v126_v42 }
  0xb1   :  { %696 = vmatpush1.bf16.msra.mxu0 %v695_v50  ;;  %700 = vmatpush1.bf16.msra.mxu1 %v699_v54 }
  0xb2   :  { %593 = vmatprep.subr.msk.mxu0 %vm376_vm1, %v347_v2  ;;  %596 = vmatprep.subr.msk.mxu1 %vm376_vm1, %v349_v3 }
  0xb3   :  { %453 = vmatprep.mubr.f32.mxu0 %v795_v6  ;;  %524 = vmatprep.mubr.f32.mxu1 %v795_v6 }
  0xb5   :  { %594 = vmatpush1.msk.msra.mxu0 %vm376_vm1, %v346_v4  ;;  %597 = vmatpush1.msk.msra.mxu1 %vm376_vm1, %v348_v5 }
 0x183   :  { %v631_v55 = vpop.f32.mrb[0].mxu0  ;;  %v325_v56 = vpop.f32.mrb[0].mxu1 }
 0x184   :  { %v632_v58 = vpop.f32.mrb[1].mxu0  ;;  %v327_v59 = vpop.f32.mrb[1].mxu1 }
 0x185   :  { %v633_v60 = vadd.f32 %v632_v58, %v631_v55 }
 0x187   :  { %v256_v61 = vadd.f32 %v633_v60, %v591_v57 }
 0x189   :  { %v916_v62 = vadd.f32 %v325_v56, %v256_v61 }
 0x18b   :  { %v329_v63 = vmul.f32 0.5, %v916_v62 }
 0x18d   :  { %v330_v0 = vmul.f32 1.442695, %v329_v63 }
 0x18f   :  { %713 = vpow2.f32 %v330_v0 }
 0x199   :  { %v714_v7 = vpop.eup %713 }
 0x19a   :  { %333 = vrot.lane.b32.xlu0 %v714_v7, %s796_s5 }
 0x20c   :  { %v334_v9 = vpop.permute.xlu0 %333 }
 0x20d   :  { %v336_v10 = vmul.f32 %v334_v9, %v66_v8 }
 0x20f   :  { %v337_v11 = vadd.f32 %v336_v10, %v916_v62 }
 0x211   :  { %595 = vmatmul.mubr.msk.f32.vlgmr.msra.gmra.mrb[2].mxu0 %vm372_vm2, %v337_v11  ;;  %598 = vmatmul.mubr.msk.f32.vlgmr.msra.gmra.mrb[2].mxu1 %vm372_vm2, %v337_v11 }
 0x2e4   :  { %v455_v22 = vpop.f32.mrb[2].mxu0  ;;  %v526_v23 = vpop.f32.mrb[2].mxu1 }
 0x2e5   :  { %v456_v24 = vadd.f32 %v455_v22, %v355_v13  ;;  %v527_v26 = vadd.f32 %v526_v23, %v363_v14  ;;  %v457_v27 = vpop.f32.mrb[3].mxu0  ;;  %v528_v28 = vpop.f32.mrb[3].mxu1 }
 0x2e6   :  { %v458_v29 = vadd.f32 %v457_v27, %v359_v21  ;;  %v529_v31 = vadd.f32 %v528_v28, %v367_v1 }
 0x2e7   :  { %v531_v32 = vmax.f32 %v456_v24, 0.0  ;;  %v533_v34 = vmax.f32 %v527_v26, 0.0 }
 0x2e8   :  { %v532_v36 = vmax.f32 %v458_v29, 0.0  ;;  %v534_v37 = vmax.f32 %v529_v31, 0.0 }
 0x2e9   :  { %v557_v38 = vmul.f32 %v540_v25, %v531_v32  ;;  %v559_v41 = vmul.f32 %v548_v35, %v533_v34 }
 0x2ea   :  { %v558_v39 = vmul.f32 %v544_v30, %v532_v36  ;;  %v560_v40 = vmul.f32 %v552_v33, %v534_v37 }
 0x2ec   :  { %v561_v17 = vadd.f32 %v558_v39, %v557_v38  ;;  %v563_v43 = vsel %vm185_vm0, %v560_v40, 0.0 }
 0x2ee   :  { %v562_v42 = vadd.f32 %v561_v17, %v559_v41 }
 0x2f0   :  { %v564_v44 = vadd.f32 %v563_v43, %v562_v42 }
 0x2f2   :  { %565 = vadd.xlane.f32.xlu1 %v564_v44 }
 0x37f   :  { %v566_v18 = vpop.xlane.xlu1 %565 }
 0x380   :  { %v569_v45 = vadd.f32 %v568_v20, %v566_v18 }
 0x382   :  { %v573_v46 = vsel %vm572_vm3, %v569_v45, %v916_v62 }
 0x383   :  { %574 = vst [vmem:[#allocation8] sm:$0xff] %v573_v46 }
 0x384   :  { %770 = shalt.err (!%p767_p6)
}
 0x385   :  { %s771_s9 = scalar_lea.hbm %s965_s10, 128 }
 0x386   :  { %p772_p7 = scmp.ne.s32.totalorder %s965_s10, %s771_s9  ;;  %p775_p8 = scmp.lt.u32.totalorder %s771_s9, %s965_s10 }
 0x388   :  { %p777_p9 = pnand %p775_p8, %p772_p7 }
 0x38a   :  { %780 = shalt.err (!%p777_p9)
}
 0x38b   :  { %584 = dma.vmem_to_hbm [thread:$0]  %s582_s30, 128, %s965_s10, [#allocation5]  }
 0x38c   :  { %785 = dma.done.wait [#allocation5], 128  }
 0x38d   :  { %786 = vsyncadd [#allocation5], 4294967168 }
 0x38e   :  { %588 = vsyncpa [#allocation4], 1 }
 0x38f   :  { %589 = vsyncpa [#allocation7], 1 }
 0x390   :  { %590 = vsyncpa [#allocation5], 1 }

</bundles_post_ra>
